<compile_context>
chip_gen: v6e
topology: v6e:2x2x1
jax: 0.10.0
libtpu: 0.0.40
codegen_flags: <defaults>
</compile_context>

<pallas_src>
import functools

import jax
import jax.numpy as jnp
from jax.experimental import pallas as pl
from jax.experimental.pallas import tpu as pltpu


_LANE = 128
_SUBLANE = 8
_MAX_TILE_ROWS = 512                    # ~85% of HBM roofline per reference data
_MAX_TILE_BYTES = 2 * 1024 * 1024       # per-input per-buffer cap (v7x 64 MiB VMEM safe)
_VMEM_LIMIT = 64 * 1024 * 1024


def _round_up(x, m):
    return ((x + m - 1) // m) * m


def _pick_tile_rows(n_rows, n_cols, itemsize):
    """Rows per grid step: a multiple of 8 (or the full extent), byte-capped."""
    if n_rows <= _SUBLANE:
        return n_rows
    cap = max(_SUBLANE,
              (_MAX_TILE_BYTES // max(1, n_cols * itemsize)) // _SUBLANE * _SUBLANE)
    tile = min(_MAX_TILE_ROWS, cap, _round_up(n_rows, _SUBLANE))
    tile = max(_SUBLANE, tile // _SUBLANE * _SUBLANE)
    if tile >= n_rows:
        return n_rows
    return tile


# ---------------------------------------------------------------------------
# traced helpers
# ---------------------------------------------------------------------------
def _kl_elem(log_input, target):
    """torch KLDivLoss(reduction='none'): where(target>0, target*(log(target)-input), 0)."""
    safe_t = jnp.where(target > 0, target, 1.0)
    return jnp.where(target > 0, target * (jnp.log(safe_t) - log_input), 0.0)


def _log_softmax(x):
    x_max = jnp.max(x, axis=-1, keepdims=True)
    lse = x_max + jnp.log(jnp.sum(jnp.exp(x - x_max), axis=-1, keepdims=True))
    return x - lse, lse


def _row_argmax(t):
    """First-occurrence argmax along the last axis -> (n, 1) int32."""
    n, c = t.shape
    col = jax.lax.broadcasted_iota(jnp.int32, (n, c), 1)
    t_max = jnp.max(t, axis=-1, keepdims=True)
    return jnp.min(jnp.where(t == t_max, col, c), axis=-1, keepdims=True)


# ---------------------------------------------------------------------------
# elementwise scalar-reduction kernels (lane-dense (rows, 128) layout)
# ---------------------------------------------------------------------------
_ELEMWISE_FNS = {
    'L1': lambda x, t: jnp.abs(x - t),
    'MSE': lambda x, t: (x - t) ** 2,
    # GaussianNLLLoss with var == 1:  0.5*(log(1) + (x-t)^2/1) == 0.5*(x-t)^2
    'logGauss': lambda x, t: 0.5 * (x - t) ** 2,
    'SKL': lambda x, t: _kl_elem(x, t) + _kl_elem(t, x),
    'JSD': lambda x, t: 0.5 * (_kl_elem(0.5 * (x + t), x)
                               + _kl_elem(0.5 * (x + t), t)),
}
# mean reduction? (SKL is .sum() in the reference)
_ELEMWISE_MEAN = {'L1': True, 'MSE': True, 'logGauss': True, 'SKL': False, 'JSD': True}


def _make_elemwise_reduce_kernel(method, scale):
    fn = _ELEMWISE_FNS[method]

    def kernel(x_ref, t_ref, out_ref, acc_ref):
        pid = pl.program_id(0)

        @pl.when(pid == 0)
        def _init():
            acc_ref[...] = jnp.zeros_like(acc_ref)

        x = x_ref[...].astype(jnp.float32)
        t = t_ref[...].astype(jnp.float32)
        v = fn(x, t)
        acc_ref[...] += jnp.sum(jnp.sum(v, axis=-1, keepdims=True),
                                axis=0, keepdims=True)

        @pl.when(pid == pl.num_programs(0) - 1)
        def _finalize():
            out_ref[...] = acc_ref[...] * jnp.float32(scale)

    return kernel


# ---------------------------------------------------------------------------
# row-wise kernels (need the class axis): CE / CEmask / Soft_Label_KLD(_mask)
# ---------------------------------------------------------------------------
def _make_rowwise_kernel(method, tile_n, n_valid, n_cols, blank_idx, needs_row_mask):
    def kernel(x_ref, t_ref, out_ref, num_ref, den_ref):
        pid = pl.program_id(0)

        @pl.when(pid == 0)
        def _init():
            num_ref[...] = jnp.zeros_like(num_ref)
            den_ref[...] = jnp.zeros_like(den_ref)

        x = x_ref[...].astype(jnp.float32)
        t = t_ref[...].astype(jnp.float32)

        if needs_row_mask:
            rows = pid * tile_n + jax.lax.broadcasted_iota(jnp.int32, (tile_n, 1), 0)
            valid = (rows < n_valid).astype(jnp.float32)          # (tile_n, 1)
        else:
            valid = None

        if method in ('CE', 'CEmask'):
            argmax_idx = _row_argmax(t)                            # (tile_n, 1)
            col = jax.lax.broadcasted_iota(jnp.int32, (tile_n, n_cols), 1)
            onehot = (col == argmax_idx).astype(jnp.float32)
            _, lse = _log_softmax(x)                               # (tile_n, 1)
            picked = jnp.sum(x * onehot, axis=-1, keepdims=True)   # (tile_n, 1)
            per_row = lse - picked
            if method == 'CEmask':
                per_row = per_row * (argmax_idx != blank_idx).astype(jnp.float32)
            if valid is not None:
                per_row = per_row * valid
            num_ref[...] += jnp.sum(per_row, axis=0, keepdims=True)
        else:  # Soft_Label_KLD / Soft_Label_KLD_mask
            log_probs, _ = _log_softmax(x)
            kl = _kl_elem(log_probs, t)                            # (tile_n, n_cols)
            if method == 'Soft_Label_KLD':
                num_ref[...] += jnp.sum(jnp.sum(kl, axis=-1, keepdims=True),
                                        axis=0, keepdims=True)
            else:
                mask = (_row_argmax(t) != blank_idx).astype(jnp.float32)  # (tile_n, 1)
                if valid is not None:
                    mask = mask * valid
                num_ref[...] += jnp.sum(jnp.sum(kl * mask, axis=-1, keepdims=True),
                                        axis=0, keepdims=True)
                den_ref[...] += jnp.sum(mask, axis=0, keepdims=True) * jnp.float32(n_cols)

        @pl.when(pid == pl.num_programs(0) - 1)
        def _finalize():
            if method in ('CE', 'CEmask'):
                out_ref[...] = num_ref[...]                        # reduction='sum'
            elif method == 'Soft_Label_KLD':
                out_ref[...] = num_ref[...] * jnp.float32(1.0 / (n_valid * n_cols))
            else:
                # guard den against "every row is blank" (torch would NaN)
                out_ref[...] = num_ref[...] / jnp.maximum(den_ref[...], 1e-6)

    return kernel


# ---------------------------------------------------------------------------
# KL reduction='none' (elementwise map, lane-dense layout, parallel grid)
# ---------------------------------------------------------------------------
def _kl_none_kernel(x_ref, t_ref, out_ref):
    x = x_ref[...].astype(jnp.float32)
    t = t_ref[...].astype(jnp.float32)
    out_ref[...] = _kl_elem(x, t).astype(out_ref.dtype)


# ---------------------------------------------------------------------------
# wrapper-side packing helpers
# ---------------------------------------------------------------------------
def _to_lane_dense(x):
    """Flatten to a zero-padded lane-dense (rows, 128) layout."""
    flat = x.reshape(-1)
    total = flat.shape[0]
    padded = _round_up(total, _LANE)
    if padded != total:
        flat = jnp.pad(flat, (0, padded - total))
    return flat.reshape(padded // _LANE, _LANE)


def _pad_rows(x, tile):
    n = x.shape[0]
    padded = _round_up(n, tile)
    if padded != n:
        x = jnp.pad(x, ((0, padded - n), (0, 0)))
    return x


# ---------------------------------------------------------------------------
# cached pallas_call builders
# ---------------------------------------------------------------------------
@functools.lru_cache(maxsize=None)
def _build_elemwise_call(method, total_elems, dtype_name, mean):
    dtype = jnp.dtype(dtype_name)
    rows = _round_up(total_elems, _LANE) // _LANE
    tile = _pick_tile_rows(rows, _LANE, dtype.itemsize)
    rows_padded = _round_up(rows, tile)
    grid = (rows_padded // tile,)
    scale = (1.0 / float(total_elems)) if mean else 1.0
    kernel = _make_elemwise_reduce_kernel(method, scale)
    transc = 2 * total_elems if method in ('SKL', 'JSD') else 0

    call = pl.pallas_call(
        kernel,
        out_shape=jax.ShapeDtypeStruct((1, 1), jnp.float32),
        grid_spec=pltpu.PrefetchScalarGridSpec(
            num_scalar_prefetch=0,
            grid=grid,
            in_specs=[pl.BlockSpec((tile, _LANE), lambda i: (i, 0)),
                      pl.BlockSpec((tile, _LANE), lambda i: (i, 0))],
            out_specs=pl.BlockSpec((1, 1), lambda i: (0, 0)),
            scratch_shapes=[pltpu.VMEM((1, 1), jnp.float32)]),
        compiler_params=pltpu.CompilerParams(
            dimension_semantics=("arbitrary",),
            vmem_limit_bytes=_VMEM_LIMIT),
        cost_estimate=pl.CostEstimate(
            flops=6 * total_elems,
            transcendentals=transc,
            bytes_accessed=2 * total_elems * dtype.itemsize),
    )

    def fn(x, t):
        x2 = _pad_rows(_to_lane_dense(x), tile)
        t2 = _pad_rows(_to_lane_dense(t), tile)
        return call(x2, t2)[0, 0]

    return jax.jit(fn)


@functools.lru_cache(maxsize=None)
def _build_rowwise_call(method, n_rows, n_cols, dtype_name, blank_idx):
    dtype = jnp.dtype(dtype_name)
    tile = _pick_tile_rows(n_rows, n_cols, dtype.itemsize)
    rows_padded = _round_up(n_rows, tile)
    grid = (rows_padded // tile,)
    needs_row_mask = rows_padded != n_rows
    kernel = _make_rowwise_kernel(method, tile, n_rows, n_cols, blank_idx,
                                  needs_row_mask)

    call = pl.pallas_call(
        kernel,
        out_shape=jax.ShapeDtypeStruct((1, 1), jnp.float32),
        grid_spec=pltpu.PrefetchScalarGridSpec(
            num_scalar_prefetch=0,
            grid=grid,
            in_specs=[pl.BlockSpec((tile, n_cols), lambda i: (i, 0)),
                      pl.BlockSpec((tile, n_cols), lambda i: (i, 0))],
            out_specs=pl.BlockSpec((1, 1), lambda i: (0, 0)),
            scratch_shapes=[pltpu.VMEM((1, 1), jnp.float32),
                            pltpu.VMEM((1, 1), jnp.float32)]),
        compiler_params=pltpu.CompilerParams(
            dimension_semantics=("arbitrary",),
            vmem_limit_bytes=_VMEM_LIMIT),
        cost_estimate=pl.CostEstimate(
            flops=8 * n_rows * n_cols,
            transcendentals=2 * n_rows * n_cols,
            bytes_accessed=2 * n_rows * n_cols * dtype.itemsize),
    )

    def fn(x, t):
        x2 = _pad_rows(x.reshape(-1, n_cols), tile)
        t2 = _pad_rows(t.reshape(-1, n_cols), tile)
        return call(x2, t2)[0, 0]

    return jax.jit(fn)


@functools.lru_cache(maxsize=None)
def _build_kl_none_call(shape, dtype_name):
    dtype = jnp.dtype(dtype_name)
    total = 1
    for s in shape:
        total *= int(s)
    rows = _round_up(total, _LANE) // _LANE
    tile = _pick_tile_rows(rows, _LANE, dtype.itemsize)
    rows_padded = _round_up(rows, tile)
    grid = (rows_padded // tile,)

    call = pl.pallas_call(
        _kl_none_kernel,
        out_shape=jax.ShapeDtypeStruct((rows_padded, _LANE), dtype),
        grid_spec=pltpu.PrefetchScalarGridSpec(
            num_scalar_prefetch=0,
            grid=grid,
            in_specs=[pl.BlockSpec((tile, _LANE), lambda i: (i, 0)),
                      pl.BlockSpec((tile, _LANE), lambda i: (i, 0))],
            out_specs=pl.BlockSpec((tile, _LANE), lambda i: (i, 0))),
        compiler_params=pltpu.CompilerParams(
            dimension_semantics=("parallel",),
            vmem_limit_bytes=_VMEM_LIMIT),
    )

    def fn(x, t):
        x2 = _pad_rows(_to_lane_dense(x), tile)
        t2 = _pad_rows(_to_lane_dense(t), tile)
        out = call(x2, t2)
        return out.reshape(-1)[:total].reshape(shape)

    return jax.jit(fn)


# ---------------------------------------------------------------------------
# module-like wrapper
# ---------------------------------------------------------------------------
class LossFunctionsAlternatives:
    """JAX/Pallas port of the PyTorch LossFunctionsAlternatives module."""

    def __init__(self):
        self.c2i = None
        self.i2c = None
        self.i2i = None
        self.loss = None
        self.component_vals = None

    def get_dictionaries_to_mask_data(self, c2i, i2c, i2i):
        self.c2i = c2i
        self.i2c = i2c
        self.i2i = i2i

    def forward(self, method, input, target, forw_per):
        del forw_per  # class axis is always last in this implementation
        x = jnp.asarray(input)
        t = jnp.asarray(target)
        dtype_name = str(x.dtype)

        if method == 'KL':
            fn = _build_kl_none_call(tuple(int(s) for s in x.shape), dtype_name)
            self.loss = fn(x, t)
            return self.loss

        if method in _ELEMWISE_FNS:
            fn = _build_elemwise_call(method, int(x.size), dtype_name,
                                      _ELEMWISE_MEAN[method])
            self.loss = fn(x, t)
            return self.loss

        if method in ('CE', 'CEmask', 'Soft_Label_KLD', 'Soft_Label_KLD_mask'):
            c = int(x.shape[-1])
            n_rows = int(x.size) // c
            blank_idx = -1
            if method in ('CEmask', 'Soft_Label_KLD_mask'):
                # TODO(synk): torch's nonzero()-gather is data-dependent and indexes
                # dim 1 with flattened (B*S) indices (only valid for B==1); we use an
                # equivalent static mask-weighted reduction instead.
                blank_idx = int(self.c2i['-'])
            fn = _build_rowwise_call(method, n_rows, c, dtype_name, blank_idx)
            self.loss = fn(x, t)
            return self.loss

        self.loss = None
        return self.loss

    __call__ = forward


# ---------------------------------------------------------------------------
# demo / smoke test
# ---------------------------------------------------------------------------
if __name__ == "__main__":
    key = jax.random.PRNGKey(0)
    B, S, C = 2, 8, 32  # batch, seq, classes/hidden
    k1, k2 = jax.random.split(key)
    x = jax.random.normal(k1, (B, S, C), dtype=jnp.float32)
    # soft-label style target (rows sum to 1)
    t = jax.nn.softmax(jax.random.normal(k2, (B, S, C), dtype=jnp.float32), axis=-1)

    crit = LossFunctionsAlternatives()
    crit.get_dictionaries_to_mask_data({'-': 0}, {0: '-'}, {0: 0})
    forw_per = (0, 2, 1)

    results = {}
    for method in ('CE', 'CEmask', 'L1', 'KL', 'SKL', 'MSE', 'logGauss',
                   'Soft_Label_KLD', 'Soft_Label_KLD_mask', 'JSD'):
        results[method] = jax.block_until_ready(crit(method, x, t, forw_per))

    # sanity checks against pure-JAX references
    assert results['KL'].shape == (B, S, C)
    assert jnp.allclose(results['MSE'], jnp.mean((x - t) ** 2), rtol=1e-5, atol=1e-6)
    assert jnp.allclose(results['L1'], jnp.mean(jnp.abs(x - t)), rtol=1e-5, atol=1e-6)
    assert jnp.allclose(results['logGauss'], 0.5 * jnp.mean((x - t) ** 2),
                        rtol=1e-5, atol=1e-6)
    lp = jax.nn.log_softmax(x, axis=-1)
    kld_ref = jnp.mean(jnp.where(t > 0, t * (jnp.log(t) - lp), 0.0))
    assert jnp.allclose(results['Soft_Label_KLD'], kld_ref, rtol=1e-5, atol=1e-6)
    kl_ref = jnp.where(t > 0, t * (jnp.log(t) - x), 0.0)
    assert jnp.allclose(results['KL'], kl_ref, rtol=1e-5, atol=1e-6)
    tgt_idx = jnp.argmax(t, axis=-1)[..., None]
    ce_ref = jnp.sum(jax.nn.logsumexp(x, axis=-1)
                     - jnp.take_along_axis(x, tgt_idx, axis=-1)[..., 0])
    assert jnp.allclose(results['CE'], ce_ref, rtol=1e-5, atol=1e-5)
    for m, v in results.items():
        assert bool(jnp.all(jnp.isfinite(v))), m

    print("KERNEL_OK")
</pallas_src>

<mosaic_0001>
module attributes {stable_mosaic.version = 11 : i64} {
  func.func @kernel(%arg0: i32, %arg1: memref<16x32xf32, #tpu.memory_space<vmem>>, %arg2: memref<16x32xf32, #tpu.memory_space<vmem>>, %arg3: memref<1x1xf32, #tpu.memory_space<vmem>>, %arg4: memref<1x1xf32, #tpu.memory_space<vmem>>, %arg5: memref<1x1xf32, #tpu.memory_space<vmem>>) attributes {dimension_semantics = [#tpu.dimension_semantics<arbitrary>], iteration_bounds = array<i64: 1>, scalar_prefetch = 0 : i64, scratch_operands = 2 : i64, tpu.core_type = #tpu.core_type<tc>, window_params = [{transform_indices = @transform_0, window_bounds = array<i64: 16, 32>}, {transform_indices = @transform_1, window_bounds = array<i64: 16, 32>}, {pipeline_mode = #tpu.pipeline_mode<synchronous>, transform_indices = @transform_2, window_bounds = array<i64: 1, 1>}]} {
    %c0_i32 = arith.constant 0 : i32
    %0 = arith.cmpi eq, %arg0, %c0_i32 : i32
    %1 = arith.extui %0 : i1 to i32
    %c0_i32_0 = arith.constant 0 : i32
    %2 = arith.cmpi ne, %1, %c0_i32_0 : i32
    scf.if %2 {
      %cst_15 = arith.constant 0.000000e+00 : f32
      %40 = vector.broadcast %cst_15 : f32 to vector<1x1xf32>
      %c0_16 = arith.constant 0 : index
      %c0_17 = arith.constant 0 : index
      %41 = vector.load %arg4[%c0_16, %c0_17] : memref<1x1xf32, #tpu.memory_space<vmem>>, vector<1x1xf32>
      tpu.vector_store %arg4[%c0_16, %c0_17], %40 {strides = array<i32>} : memref<1x1xf32, #tpu.memory_space<vmem>>, vector<1x1xf32>,
      %cst_18 = arith.constant 0.000000e+00 : f32
      %42 = vector.broadcast %cst_18 : f32 to vector<1x1xf32>
      %c0_19 = arith.constant 0 : index
      %c0_20 = arith.constant 0 : index
      %43 = vector.load %arg5[%c0_19, %c0_20] : memref<1x1xf32, #tpu.memory_space<vmem>>, vector<1x1xf32>
      tpu.vector_store %arg5[%c0_19, %c0_20], %42 {strides = array<i32>} : memref<1x1xf32, #tpu.memory_space<vmem>>, vector<1x1xf32>,
    } else {
    }
    %c0 = arith.constant 0 : index
    %c0_1 = arith.constant 0 : index
    %3 = vector.load %arg1[%c0, %c0_1] : memref<16x32xf32, #tpu.memory_space<vmem>>, vector<16x32xf32>
    %c0_2 = arith.constant 0 : index
    %c0_3 = arith.constant 0 : index
    %4 = vector.load %arg2[%c0_2, %c0_3] : memref<16x32xf32, #tpu.memory_space<vmem>>, vector<16x32xf32>
    %5 = tpu.iota {dimensions = array<i32: 1>} : vector<16x32xi32>
    %cst = arith.constant dense<0xFF800000> : vector<16xf32>
    %6 = vector.multi_reduction <maximumf>, %4, %cst [1] : vector<16x32xf32> to vector<16xf32>
    %7 = vector.shape_cast %6 : vector<16xf32> to vector<16x1xf32>
    %8 = vector.broadcast %7 : vector<16x1xf32> to vector<16x32xf32>
    %9 = arith.cmpf oeq, %4, %8 : vector<16x32xf32>
    %c32_i32 = arith.constant 32 : i32
    %10 = vector.broadcast %c32_i32 : i32 to vector<16x32xi32>
    %11 = arith.select %9, %5, %10 : vector<16x32xi1>, vector<16x32xi32>
    %cst_4 = arith.constant dense<2147483647> : vector<16xi32>
    %12 = vector.multi_reduction <minsi>, %11, %cst_4 [1] : vector<16x32xi32> to vector<16xi32>
    %13 = vector.shape_cast %12 : vector<16xi32> to vector<16x1xi32>
    %14 = tpu.iota {dimensions = array<i32: 1>} : vector<16x32xi32>
    %15 = vector.broadcast %13 : vector<16x1xi32> to vector<16x32xi32>
    %16 = arith.cmpi eq, %14, %15 : vector<16x32xi32>
    %17 = arith.extui %16 : vector<16x32xi1> to vector<16x32xi32>
    %18 = arith.sitofp %17 : vector<16x32xi32> to vector<16x32xf32>
    %cst_5 = arith.constant dense<0xFF800000> : vector<16xf32>
    %19 = vector.multi_reduction <maximumf>, %3, %cst_5 [1] : vector<16x32xf32> to vector<16xf32>
    %20 = vector.shape_cast %19 : vector<16xf32> to vector<16x1xf32>
    %21 = vector.broadcast %20 : vector<16x1xf32> to vector<16x32xf32>
    %22 = arith.subf %3, %21 : vector<16x32xf32>
    %23 = math.exp %22 : vector<16x32xf32>
    %cst_6 = arith.constant dense<0.000000e+00> : vector<16xf32>
    %24 = vector.multi_reduction <add>, %23, %cst_6 [1] : vector<16x32xf32> to vector<16xf32>
    %25 = vector.shape_cast %24 : vector<16xf32> to vector<16x1xf32>
    %26 = math.log %25 : vector<16x1xf32>
    %27 = arith.addf %20, %26 : vector<16x1xf32>
    %28 = arith.mulf %3, %18 : vector<16x32xf32>
    %cst_7 = arith.constant dense<0.000000e+00> : vector<16xf32>
    %29 = vector.multi_reduction <add>, %28, %cst_7 [1] : vector<16x32xf32> to vector<16xf32>
    %30 = vector.shape_cast %29 : vector<16xf32> to vector<16x1xf32>
    %31 = arith.subf %27, %30 : vector<16x1xf32>
    %c0_8 = arith.constant 0 : index
    %c0_9 = arith.constant 0 : index
    %32 = vector.load %arg4[%c0_8, %c0_9] : memref<1x1xf32, #tpu.memory_space<vmem>>, vector<1x1xf32>
    %cst_10 = arith.constant dense<0.000000e+00> : vector<1xf32>
    %33 = vector.multi_reduction <add>, %31, %cst_10 [0] : vector<16x1xf32> to vector<1xf32>
    %34 = vector.shape_cast %33 : vector<1xf32> to vector<1x1xf32>
    %35 = arith.addf %32, %34 : vector<1x1xf32>
    %c0_11 = arith.constant 0 : index
    %c0_12 = arith.constant 0 : index
    %36 = vector.load %arg4[%c0_11, %c0_12] : memref<1x1xf32, #tpu.memory_space<vmem>>, vector<1x1xf32>
    tpu.vector_store %arg4[%c0_11, %c0_12], %35 {strides = array<i32>} : memref<1x1xf32, #tpu.memory_space<vmem>>, vector<1x1xf32>,
    %c0_i32_13 = arith.constant 0 : i32
    %37 = arith.cmpi eq, %arg0, %c0_i32_13 : i32
    %38 = arith.extui %37 : i1 to i32
    %c0_i32_14 = arith.constant 0 : i32
    %39 = arith.cmpi ne, %38, %c0_i32_14 : i32
    scf.if %39 {
      %c0_15 = arith.constant 0 : index
      %c0_16 = arith.constant 0 : index
      %40 = vector.load %arg4[%c0_15, %c0_16] : memref<1x1xf32, #tpu.memory_space<vmem>>, vector<1x1xf32>
      %c0_17 = arith.constant 0 : index
      %c0_18 = arith.constant 0 : index
      %41 = vector.load %arg3[%c0_17, %c0_18] : memref<1x1xf32, #tpu.memory_space<vmem>>, vector<1x1xf32>
      tpu.vector_store %arg3[%c0_17, %c0_18], %40 {strides = array<i32>} : memref<1x1xf32, #tpu.memory_space<vmem>>, vector<1x1xf32>,
    } else {
    }
    return
  }
  func.func @transform_0(%arg0: i32) -> (i32, i32) {
    %c0_i32 = arith.constant 0 : i32
    %c0_i32_0 = arith.constant 0 : i32
    return %arg0, %c0_i32 : i32, i32
  }
  func.func @transform_1(%arg0: i32) -> (i32, i32) {
    %c0_i32 = arith.constant 0 : i32
    %c0_i32_0 = arith.constant 0 : i32
    return %arg0, %c0_i32 : i32, i32
  }
  func.func @transform_2(%arg0: i32) -> (i32, i32) {
    %c0_i32 = arith.constant 0 : i32
    %c0_i32_0 = arith.constant 0 : i32
    %c0_i32_1 = arith.constant 0 : i32
    return %c0_i32, %c0_i32_0 : i32, i32
  }
}

</mosaic_0001>

<bundles_post_ra>
// kernel: fn.1
= control target key start
LH: loop header
LB: loop body
LE: loop exit
PB: predicated region body
PF: predicated region fallthrough
CT: control target
= control target key end

     0   :  { %7 = vsyncpa [#allocation5], 0  ;;  %s291_s0 = inlined_call_operand.hbm [shape: f32[16,32], index: 0, kind: input, shape index: {}]   ;;  %s292_s1 = inlined_call_operand.hbm [shape: f32[16,32], index: 1, kind: input, shape index: {}]   ;;  %s293_s2 = inlined_call_operand.hbm [shape: f32[1,1], index: 2, kind: output, shape index: {}]  }
   0x1   :  { %8 = vsyncpa [#allocation8], 0 }
   0x2   :  { %9 = vsyncpa [#allocation6], 0  ;;  %s248_s9 = smov [#allocation4]  }
   0x3   :  { %s15_s10 = sshll.u32 %s248_s9, 4  ;;  %s16_s10 = int_to_ptr.vmem [resolvable:$true] %s15_s10 }
   0x4   :  { %s190_s11 = scalar_lea.vmem %s16_s10, 256  ;;  %p195_p1 = scmp.lt.s32.totalorder %s16_s10, %s16_s10 }
   0x5   :  { %p191_p0 = scmp.ne.s32.totalorder %s16_s10, %s190_s11  ;;  %p196_p2 = scmp.lt.s32.totalorder %s190_s11, %s190_s11 }
   0x7   :  { %p197_p3 = por %p196_p2, %p195_p1 }
   0x9   :  { %p198_p4 = pnand %p197_p3, %p191_p0 }
   0xb   :  { %201 = shalt.err (!%p198_p4)
}
   0xc   :  { %s249_s12 = smov 128   ;;  %s250_s13 = smov 8  }
   0xd   :  { %21 = dma.hbm_to_vmem [thread:$0]  %s291_s0, 256, %s16_s10, [#allocation5], %s249_s12, %s249_s12, %s250_s13  }
   0xe   :  { %s251_s16 = smov [#allocation7]  }
   0xf   :  { %s27_s17 = sshll.u32 %s251_s16, 4  ;;  %s28_s17 = int_to_ptr.vmem [resolvable:$true] %s27_s17 }
  0x10   :  { %s210_s18 = scalar_lea.vmem %s28_s17, 256  ;;  %p215_p6 = scmp.lt.s32.totalorder %s28_s17, %s28_s17 }
  0x11   :  { %p211_p5 = scmp.ne.s32.totalorder %s28_s17, %s210_s18  ;;  %p216_p7 = scmp.lt.s32.totalorder %s210_s18, %s210_s18 }
  0x13   :  { %p217_p8 = por %p216_p7, %p215_p6 }
  0x15   :  { %p218_p9 = pnand %p217_p8, %p211_p5 }
  0x17   :  { %221 = shalt.err (!%p218_p9)
}
  0x18   :  { %33 = dma.hbm_to_vmem [thread:$0]  %s292_s1, 256, %s28_s17, [#allocation8], %s249_s12, %s249_s12, %s250_s13  }
  0x19   :  { %242 = dma.done.wait [#allocation5], 256  }
  0x1a   :  { %243 = vsyncadd [#allocation5], 4294967040 }
  0x1b   :  { %244 = dma.done.wait [#allocation8], 256  }
  0x1c   :  { %245 = vsyncadd [#allocation8], 4294967040  ;;  %vm53_vm0 = vcmask 261120   ;;  %v49_v0 = vld [vmem:[#allocation7] sm:$0xff]  ;;  %v50_v1 = vld [vmem:[#allocation7 + $0x8] sm:$0xff]  ;;  %v51_v6 = vlaneseq  ;;  %v252_v47 = vmov 0.0  }
  0x1d   :  { %v54_v2 = vsel %vm53_vm0, %v49_v0, -inf  ;;  %v57_v3 = vsel %vm53_vm0, %v50_v1, -inf  ;;  %v47_v4 = vld [vmem:[#allocation4] sm:$0xff]  ;;  %v48_v18 = vld [vmem:[#allocation4 + $0x8] sm:$0xff]  ;;  %vm44_vm7 = vcmask 0   ;;  %s253_s0 = smov [#allocation9]  }
  0x1e   :  { %55 = vmax.xlane.f32.xlu0 %v54_v2  ;;  %v100_v5 = vsel %vm53_vm0, %v47_v4, -inf  ;;  %v52_v7 = vand.u32 127, %v51_v6  ;;  %v103_v19 = vsel %vm53_vm0, %v48_v18, -inf  ;;  %45 = vst.msk [vmem:[#allocation2] sm:$0x1] %vm44_vm7, %v252_v47  ;;  %s156_s1 = sshll.u32 %s253_s0, 4  ;;  %s157_s1 = int_to_ptr.vmem [resolvable:$true] %s156_s1 }
  0x1f   :  { %s222_s21 = scalar_lea.vmem %s157_s1, 16  ;;  %s226_s22 = scalar_lea.vmem %s157_s1, 32 }
  0x20   :  { %p223_p10 = scmp.ne.s32.totalorder %s157_s1, %s222_s21  ;;  %p227_p11 = scmp.lt.s32.totalorder %s157_s1, %s157_s1 }
  0x21   :  { %p228_p12 = scmp.lt.s32.totalorder %s226_s22, %s222_s21 }
  0x22   :  { %58 = vmax.xlane.f32.xlu0 %v57_v3 }
  0x23   :  { %p229_p13 = por %p228_p12, %p227_p11 }
  0x25   :  { %p230_p0 = pnand %p229_p13, %p223_p10 }
  0x26   :  { %101 = vmax.xlane.f32.xlu0 %v100_v5 }
  0xa7   :  { %v56_v8 = vpop.xlane.xlu0 %55 }
  0xa8   :  { %vm60_vm1 = vcmp.eq.f32.partialorder %v49_v0, %v56_v8 }
  0xa9   :  { %v62_v9 = vsel %vm60_vm1, %v52_v7, 32 }
  0xaa   :  { %v64_v10 = vsel %vm53_vm0, %v62_v9, 2147483647  ;;  %v134_v9 = vld [vmem:[#allocation2] sm:$0x1] }
  0xab   :  { %v59_v11 = vpop.xlane.xlu0 %58  ;;  %v66_v12 = vshra.s32 %v64_v10, 16  ;;  %v65_v23 = vand.u32 65535, %v64_v10 }
  0xac   :  { %vm61_vm2 = vcmp.eq.f32.partialorder %v50_v1, %v59_v11 }
  0xad   :  { %v63_v13 = vsel %vm61_vm2, %v52_v7, 32  ;;  %v68_v14 = vcvt.s32.f32 %v66_v12  ;;  %v67_v25 = vcvt.s32.f32 %v65_v23 }
  0xae   :  { %v79_v15 = vsel %vm53_vm0, %v63_v13, 2147483647 }
  0xaf   :  { %69 = vmin.xlane.f32.xlu1 %v68_v14  ;;  %v81_v16 = vshra.s32 %v79_v15, 16  ;;  %v102_v20 = vpop.xlane.xlu0 %101  ;;  %v80_v26 = vand.u32 65535, %v79_v15 }
  0xb0   :  { %v106_v21 = vsub.f32 %v47_v4, %v102_v20 }
  0xb1   :  { %v83_v17 = vcvt.s32.f32 %v81_v16  ;;  %v82_v30 = vcvt.s32.f32 %v80_v26 }
  0xb2   :  { %v108_v22 = vmul.f32 1.442695, %v106_v21 }
  0xb3   :  { %84 = vmin.xlane.f32.xlu1 %v83_v17 }
  0xb4   :  { %174 = vpow2.f32 %v108_v22 }
  0xb7   :  { %104 = vmax.xlane.f32.xlu1 %v103_v19 }
  0xc1   :  { %v175_v27 = vpop.eup %174 }
  0xc2   :  { %v112_v31 = vsel %vm53_vm0, %v175_v27, 0.0 }
 0x138   :  { %v70_v24 = vpop.xlane.xlu1 %69 }
 0x139   :  { %vm71_vm3 = vcmp.eq.f32.partialorder %v68_v14, %v70_v24  ;;  %v76_v38 = vcvt.f32.s32 %v70_v24 }
 0x13a   :  { %v72_v28 = vsel %vm71_vm3, %v67_v25, inf }
 0x13b   :  { %73 = vmin.xlane.f32.xlu0 %v72_v28  ;;  %v77_v40 = vshll.u32 %v76_v38, 16 }
 0x13c   :  { %v85_v29 = vpop.xlane.xlu1 %84 }
 0x13d   :  { %vm86_vm4 = vcmp.eq.f32.partialorder %v83_v17, %v85_v29  ;;  %v91_v41 = vcvt.f32.s32 %v85_v29 }
 0x13e   :  { %v87_v32 = vsel %vm86_vm4, %v82_v30, inf }
 0x13f   :  { %88 = vmin.xlane.f32.xlu1 %v87_v32  ;;  %113 = vadd.xlane.f32.xlu0 %v112_v31  ;;  %v92_v45 = vshll.u32 %v91_v41, 16 }
 0x140   :  { %v105_v33 = vpop.xlane.xlu1 %104 }
 0x141   :  { %v107_v34 = vsub.f32 %v48_v18, %v105_v33 }
 0x143   :  { %v110_v35 = vmul.f32 1.442695, %v107_v34 }
 0x145   :  { %176 = vpow2.f32 %v110_v35 }
 0x152   :  { %v177_v36 = vpop.eup %176 }
 0x153   :  { %v115_v37 = vsel %vm53_vm0, %v177_v36, 0.0 }
 0x154   :  { %116 = vadd.xlane.f32.xlu1 %v115_v37 }
 0x1c4   :  { %v74_v39 = vpop.xlane.xlu0 %73 }
 0x1c5   :  { %v75_v42 = vcvt.f32.s32 %v74_v39 }
 0x1c7   :  { %v78_v43 = vadd.s32 %v77_v40, %v75_v42 }
 0x1c8   :  { %v89_v44 = vpop.xlane.xlu1 %88  ;;  %v114_v55 = vpop.xlane.xlu0 %113 }
 0x1c9   :  { %v90_v46 = vcvt.f32.s32 %v89_v44  ;;  %vm94_vm5 = vcmp.eq.s32.totalorder %v52_v7, %v78_v43  ;;  %178 = vlog2.f32 %v114_v55 }
 0x1ca   :  { %v166_v48 = vsel %vm94_vm5, 1.0, %v252_v47 }
 0x1cb   :  { %v93_v49 = vadd.s32 %v92_v45, %v90_v46  ;;  %v124_v50 = vmul.f32 %v166_v48, %v47_v4 }
 0x1cd   :  { %v126_v51 = vsel %vm53_vm0, %v124_v50, 0.0  ;;  %vm95_vm6 = vcmp.eq.s32.totalorder %v52_v7, %v93_v49 }
 0x1ce   :  { %127 = vadd.xlane.f32.xlu0 %v126_v51  ;;  %v167_v52 = vsel %vm95_vm6, 1.0, %v252_v47 }
 0x1cf   :  { %v125_v53 = vmul.f32 %v167_v52, %v48_v18 }
 0x1d1   :  { %v129_v54 = vsel %vm53_vm0, %v125_v53, 0.0 }
 0x1d2   :  { %130 = vadd.xlane.f32.xlu1 %v129_v54 }
 0x1d6   :  { %v179_v57 = vpop.eup %178 }
 0x1d7   :  { %v119_v59 = vmul.f32 0.6931472, %v179_v57 }
 0x1d9   :  { %v122_v62 = vadd.f32 %v119_v59, %v102_v20 }
 0x1dd   :  { %v117_v56 = vpop.xlane.xlu1 %116 }
 0x1de   :  { %180 = vlog2.f32 %v117_v56 }
 0x1eb   :  { %v181_v58 = vpop.eup %180 }
 0x1ec   :  { %v121_v60 = vmul.f32 0.6931472, %v181_v58 }
 0x1ee   :  { %v123_v63 = vadd.f32 %v121_v60, %v105_v33 }
 0x257   :  { %v128_v61 = vpop.xlane.xlu0 %127 }
 0x258   :  { %v132_v1 = vsub.f32 %v122_v62, %v128_v61 }
 0x25b   :  { %v131_v0 = vpop.xlane.xlu1 %130 }
 0x25c   :  { %v133_v2 = vsub.f32 %v123_v63, %v131_v0 }
 0x25e   :  { %v135_v3 = vadd.f32 %v133_v2, %v132_v1 }
 0x260   :  { %v136_v4 = vrot.slane %v135_v3, 4 }
 0x262   :  { %v137_v5 = vadd.f32 %v136_v4, %v135_v3 }
 0x264   :  { %v138_v6 = vrot.slane %v137_v5, 2 }
 0x266   :  { %v139_v7 = vadd.f32 %v138_v6, %v137_v5 }
 0x268   :  { %v140_v8 = vrot.slane %v139_v7, 1 }
 0x26a   :  { %v141_v10 = vadd.f32 %v140_v8, %v139_v7 }
 0x26c   :  { %v142_v11 = vadd.f32 %v141_v10, %v134_v9 }
 0x26e   :  { %144 = vst.msk [vmem:[#allocation2] sm:$0x1] %vm44_vm7, %v142_v11 }
 0x275   :  { %v148_v12 = vld [vmem:[#allocation2] sm:$0x1] }
 0x276   :  { %149 = vst.msk [vmem:[#allocation9] sm:$0x1] %vm44_vm7, %v148_v12 }
 0x277   :  { %233 = shalt.err (!%p230_p0)
}
 0x278   :  { %159 = dma.vmem_to_hbm [thread:$0]  %s157_s1, 16, %s293_s2, [#allocation6]  }
 0x279   :  { %246 = dma.done.wait [#allocation6], 16  }
 0x27a   :  { %247 = vsyncadd [#allocation6], 4294967280 }
 0x27b   :  { %163 = vsyncpa [#allocation5], 1 }
 0x27c   :  { %164 = vsyncpa [#allocation8], 1 }
 0x27d   :  { %165 = vsyncpa [#allocation6], 1 }

</bundles_post_ra>
